<compile_context>
chip_gen: v7x
topology: tpu7x:2x2x1
jax: 0.10.0
libtpu: 0.0.40
codegen_flags: <defaults>
</compile_context>

<pallas_src>
import math
import jax
import jax.numpy as jnp
from jax.experimental import pallas as pl
from jax.experimental.pallas import tpu as pltpu

# ---------------- model dims (small, consistent with the module) -------------
B = 2           # batch
S = 8           # sequence length
D = 32          # d_model
H = 4           # num_heads
DH = D // H     # head dim
DFF = 64        # d_ff
N = B * S       # total rows
LN_EPS = 1e-5   # torch.nn.LayerNorm default
NEG_INF = -1e9


# =============================================================================
# Fused encoder-layer kernel (single grid step, everything in VMEM / registers)
# =============================================================================
def encoder_layer_kernel(x_ref, mask_ref,
                         wqkv_ref, bqkv_ref, wo_ref, bo_ref,
                         ln1_g_ref, ln1_b_ref,
                         w1_ref, b1_ref, w2_ref, b2_ref,
                         ln2_g_ref, ln2_b_ref,
                         o_ref):
    x = x_ref[...]                                            # (N, D)

    # ---- mask prep hoisted out of the head loop (compare emitted once) ------
    masked = mask_ref[...] == 0.0                             # (B, 1, S) bool

    # ---- fused QKV projection (1/sqrt(DH) pre-folded into the Q slice) ------
    qkv = jnp.dot(x, wqkv_ref[...],
                  preferred_element_type=jnp.float32) + bqkv_ref[...]   # (N, 3D)

    # ---- multi-head attention: static unroll over H=4, registers only ------
    ctx_heads = []
    for h in range(H):
        qh = qkv[:, h * DH:(h + 1) * DH].reshape(B, S, DH)            # (B,S,DH)
        kh = qkv[:, D + h * DH:D + (h + 1) * DH].reshape(B, S, DH)
        vh = qkv[:, 2 * D + h * DH:2 * D + (h + 1) * DH].reshape(B, S, DH)

        # scores = Qh . Kh^T  (contract last dims; no explicit transpose)
        s = jnp.einsum('bqd,bkd->bqk', qh, kh,
                       preferred_element_type=jnp.float32)            # (B,S,S)
        s = jnp.where(masked, NEG_INF, s)                             # broadcast

        m = jnp.max(s, axis=-1, keepdims=True)
        p = jnp.exp(s - m)
        # divide -> EUP reciprocal (frees the VALU slots)
        p = p * pl.reciprocal(jnp.sum(p, axis=-1, keepdims=True), approx=True)

        ctx_h = jnp.einsum('bqk,bkd->bqd', p, vh,
                           preferred_element_type=jnp.float32)        # (B,S,DH)
        ctx_heads.append(ctx_h.reshape(N, DH))

    ctx = jnp.concatenate(ctx_heads, axis=-1)                         # (N, D)
    attn = jnp.dot(ctx, wo_ref[...],
                   preferred_element_type=jnp.float32) + bo_ref[...]  # (N, D)

    # ---- residual + LayerNorm 1 (dropout1 = identity in eval mode) ----------
    z = x + attn
    mu = jnp.mean(z, axis=-1, keepdims=True)
    var = jnp.mean(jnp.square(z - mu), axis=-1, keepdims=True)
    x1 = (z - mu) * jax.lax.rsqrt(var + LN_EPS) * ln1_g_ref[...] + ln1_b_ref[...]

    # ---- position-wise feed-forward -----------------------------------------
    hdn = jnp.dot(x1, w1_ref[...],
                  preferred_element_type=jnp.float32) + b1_ref[...]   # (N, DFF)
    hdn = jnp.maximum(hdn, 0.0)
    ff = jnp.dot(hdn, w2_ref[...],
                 preferred_element_type=jnp.float32) + b2_ref[...]    # (N, D)

    # ---- residual + LayerNorm 2 (dropout2 = identity in eval mode) ----------
    z2 = x1 + ff
    mu2 = jnp.mean(z2, axis=-1, keepdims=True)
    var2 = jnp.mean(jnp.square(z2 - mu2), axis=-1, keepdims=True)
    o_ref[...] = ((z2 - mu2) * jax.lax.rsqrt(var2 + LN_EPS)
                  * ln2_g_ref[...] + ln2_b_ref[...]).astype(o_ref.dtype)


# =============================================================================
# One-time parameter packing (outside the per-call path)
# =============================================================================
def pack_params(params):
    """Pack Q/K/V into a single [D, 3D] matrix with 1/sqrt(DH) folded into Q."""
    scale = 1.0 / math.sqrt(DH)
    return {
        "wqkv": jnp.concatenate(
            [params["wq"] * scale, params["wk"], params["wv"]], axis=1),  # (D,3D)
        "bqkv": jnp.concatenate(
            [params["bq"] * scale, params["bk"], params["bv"]], axis=1),  # (1,3D)
        "wo": params["wo"], "bo": params["bo"],
        "ln1_g": params["ln1_g"], "ln1_b": params["ln1_b"],
        "w1": params["w1"], "b1": params["b1"],
        "w2": params["w2"], "b2": params["b2"],
        "ln2_g": params["ln2_g"], "ln2_b": params["ln2_b"],
    }


# =============================================================================
# Wrapper: one pallas_call, reshape output back to (B, S, D)
# =============================================================================
@jax.jit
def encoder_layer(x, mask, kp):
    x2d = x.reshape(N, D)

    out2d = pl.pallas_call(
        encoder_layer_kernel,
        out_shape=jax.ShapeDtypeStruct((N, D), jnp.float32),
        grid=(1,),
        in_specs=[
            pl.BlockSpec((N, D), lambda i: (0, 0)),          # x
            pl.BlockSpec((B, 1, S), lambda i: (0, 0, 0)),    # mask
            pl.BlockSpec((D, 3 * D), lambda i: (0, 0)),      # wqkv
            pl.BlockSpec((1, 3 * D), lambda i: (0, 0)),      # bqkv
            pl.BlockSpec((D, D), lambda i: (0, 0)),          # wo
            pl.BlockSpec((1, D), lambda i: (0, 0)),          # bo
            pl.BlockSpec((1, D), lambda i: (0, 0)),          # ln1_g
            pl.BlockSpec((1, D), lambda i: (0, 0)),          # ln1_b
            pl.BlockSpec((D, DFF), lambda i: (0, 0)),        # w1
            pl.BlockSpec((1, DFF), lambda i: (0, 0)),        # b1
            pl.BlockSpec((DFF, D), lambda i: (0, 0)),        # w2
            pl.BlockSpec((1, D), lambda i: (0, 0)),          # b2
            pl.BlockSpec((1, D), lambda i: (0, 0)),          # ln2_g
            pl.BlockSpec((1, D), lambda i: (0, 0)),          # ln2_b
        ],
        out_specs=pl.BlockSpec((N, D), lambda i: (0, 0)),
        compiler_params=pltpu.CompilerParams(
            dimension_semantics=("arbitrary",)),
    )(x2d, mask, kp["wqkv"], kp["bqkv"], kp["wo"], kp["bo"],
      kp["ln1_g"], kp["ln1_b"],
      kp["w1"], kp["b1"], kp["w2"], kp["b2"],
      kp["ln2_g"], kp["ln2_b"])

    return out2d.reshape(B, S, D)


# =============================================================================
# Pure-JAX reference (same math, no Pallas) for a correctness check
# =============================================================================
def encoder_layer_ref(x, mask, params):
    hp = jax.lax.Precision.HIGHEST

    def linear(v, w, b):
        return jnp.dot(v, w, precision=hp) + b

    q = linear(x, params["wq"], params["bq"])                 # (B, S, D)
    k = linear(x, params["wk"], params["bk"])
    v = linear(x, params["wv"], params["bv"])

    def split(t):
        return t.reshape(B, S, H, DH).transpose(0, 2, 1, 3)   # (B, H, S, DH)

    qh, kh, vh = split(q), split(k), split(v)
    scores = jnp.einsum('bhqd,bhkd->bhqk', qh, kh, precision=hp) / math.sqrt(DH)
    scores = jnp.where(mask[:, None, :, :] == 0.0, NEG_INF, scores)
    attn = jax.nn.softmax(scores, axis=-1)
    ctx = jnp.einsum('bhqk,bhkd->bhqd', attn, vh, precision=hp)
    ctx = ctx.transpose(0, 2, 1, 3).reshape(B, S, D)
    attn_out = linear(ctx, params["wo"], params["bo"])

    def ln(z, g, b):
        mu = z.mean(-1, keepdims=True)
        var = ((z - mu) ** 2).mean(-1, keepdims=True)
        return (z - mu) * jax.lax.rsqrt(var + LN_EPS) * g + b

    x1 = ln(x + attn_out, params["ln1_g"], params["ln1_b"])
    ff = linear(jnp.maximum(linear(x1, params["w1"], params["b1"]), 0.0),
                params["w2"], params["b2"])
    return ln(x1 + ff, params["ln2_g"], params["ln2_b"])


# =============================================================================
# Parameter init (independent keys per weight / bias)
# =============================================================================
def init_params(key):
    ks = jax.random.split(key, 12)

    def lin(k, fan_in, shape):
        bound = 1.0 / math.sqrt(fan_in)
        return jax.random.uniform(k, shape, jnp.float32, -bound, bound)

    return {
        "wq": lin(ks[0], D, (D, D)),     "bq": lin(ks[1], D, (1, D)),
        "wk": lin(ks[2], D, (D, D)),     "bk": lin(ks[3], D, (1, D)),
        "wv": lin(ks[4], D, (D, D)),     "bv": lin(ks[5], D, (1, D)),
        "wo": lin(ks[6], D, (D, D)),     "bo": lin(ks[7], D, (1, D)),
        "w1": lin(ks[8], D, (D, DFF)),   "b1": lin(ks[9], D, (1, DFF)),
        "w2": lin(ks[10], DFF, (DFF, D)), "b2": lin(ks[11], DFF, (1, D)),
        "ln1_g": jnp.ones((1, D), jnp.float32), "ln1_b": jnp.zeros((1, D), jnp.float32),
        "ln2_g": jnp.ones((1, D), jnp.float32), "ln2_b": jnp.zeros((1, D), jnp.float32),
    }


if __name__ == "__main__":
    key = jax.random.PRNGKey(0)
    kx, kp = jax.random.split(key)
    x = jax.random.normal(kx, (B, S, D), jnp.float32)
    # mask: keep everything for batch 0, mask last 2 key positions for batch 1
    mask = jnp.ones((B, 1, S), jnp.float32)
    mask = mask.at[1, 0, -2:].set(0.0)
    params = init_params(kp)

    # one-time QKV packing (outside the per-call jitted path)
    kernel_params = jax.tree_util.tree_map(jax.block_until_ready,
                                           pack_params(params))

    out = encoder_layer(x, mask, kernel_params)
    jax.block_until_ready(out)
    assert out.shape == (B, S, D)

    ref = encoder_layer_ref(x, mask, params)
    err = float(jnp.max(jnp.abs(out - ref)))
    assert err < 2e-3, f"mismatch vs reference: max abs err = {err}"

    print("KERNEL_OK")
</pallas_src>

<mosaic_0001>
module attributes {stable_mosaic.version = 11 : i64} {
  func.func @encoder_layer_kernel(%arg0: i32, %arg1: memref<16x32xf32, #tpu.memory_space<vmem>>, %arg2: memref<2x1x8xf32, #tpu.memory_space<vmem>>, %arg3: memref<32x96xf32, #tpu.memory_space<vmem>>, %arg4: memref<1x96xf32, #tpu.memory_space<vmem>>, %arg5: memref<32x32xf32, #tpu.memory_space<vmem>>, %arg6: memref<1x32xf32, #tpu.memory_space<vmem>>, %arg7: memref<1x32xf32, #tpu.memory_space<vmem>>, %arg8: memref<1x32xf32, #tpu.memory_space<vmem>>, %arg9: memref<32x64xf32, #tpu.memory_space<vmem>>, %arg10: memref<1x64xf32, #tpu.memory_space<vmem>>, %arg11: memref<64x32xf32, #tpu.memory_space<vmem>>, %arg12: memref<1x32xf32, #tpu.memory_space<vmem>>, %arg13: memref<1x32xf32, #tpu.memory_space<vmem>>, %arg14: memref<1x32xf32, #tpu.memory_space<vmem>>, %arg15: memref<16x32xf32, #tpu.memory_space<vmem>>) attributes {dimension_semantics = [#tpu.dimension_semantics<arbitrary>], iteration_bounds = array<i64: 1>, scalar_prefetch = 0 : i64, scratch_operands = 0 : i64, tpu.core_type = #tpu.core_type<tc>, window_params = [{pipeline_mode = #tpu.pipeline_mode<synchronous>, transform_indices = @transform_0, window_bounds = array<i64: 16, 32>}, {pipeline_mode = #tpu.pipeline_mode<synchronous>, transform_indices = @transform_1, window_bounds = array<i64: 2, 1, 8>}, {pipeline_mode = #tpu.pipeline_mode<synchronous>, transform_indices = @transform_2, window_bounds = array<i64: 32, 96>}, {pipeline_mode = #tpu.pipeline_mode<synchronous>, transform_indices = @transform_3, window_bounds = array<i64: 1, 96>}, {pipeline_mode = #tpu.pipeline_mode<synchronous>, transform_indices = @transform_4, window_bounds = array<i64: 32, 32>}, {pipeline_mode = #tpu.pipeline_mode<synchronous>, transform_indices = @transform_5, window_bounds = array<i64: 1, 32>}, {pipeline_mode = #tpu.pipeline_mode<synchronous>, transform_indices = @transform_6, window_bounds = array<i64: 1, 32>}, {pipeline_mode = #tpu.pipeline_mode<synchronous>, transform_indices = @transform_7, window_bounds = array<i64: 1, 32>}, {pipeline_mode = #tpu.pipeline_mode<synchronous>, transform_indices = @transform_8, window_bounds = array<i64: 32, 64>}, {pipeline_mode = #tpu.pipeline_mode<synchronous>, transform_indices = @transform_9, window_bounds = array<i64: 1, 64>}, {pipeline_mode = #tpu.pipeline_mode<synchronous>, transform_indices = @transform_10, window_bounds = array<i64: 64, 32>}, {pipeline_mode = #tpu.pipeline_mode<synchronous>, transform_indices = @transform_11, window_bounds = array<i64: 1, 32>}, {pipeline_mode = #tpu.pipeline_mode<synchronous>, transform_indices = @transform_12, window_bounds = array<i64: 1, 32>}, {pipeline_mode = #tpu.pipeline_mode<synchronous>, transform_indices = @transform_13, window_bounds = array<i64: 1, 32>}, {pipeline_mode = #tpu.pipeline_mode<synchronous>, transform_indices = @transform_14, window_bounds = array<i64: 16, 32>}]} {
    %c0 = arith.constant 0 : index
    %c0_0 = arith.constant 0 : index
    %0 = vector.load %arg1[%c0, %c0_0] : memref<16x32xf32, #tpu.memory_space<vmem>>, vector<16x32xf32>
    %c0_1 = arith.constant 0 : index
    %c0_2 = arith.constant 0 : index
    %c0_3 = arith.constant 0 : index
    %1 = vector.load %arg2[%c0_1, %c0_2, %c0_3] : memref<2x1x8xf32, #tpu.memory_space<vmem>>, vector<2x1x8xf32>
    %cst = arith.constant 0.000000e+00 : f32
    %2 = vector.broadcast %cst : f32 to vector<2x1x8xf32>
    %3 = arith.cmpf oeq, %1, %2 : vector<2x1x8xf32>
    %c0_4 = arith.constant 0 : index
    %c0_5 = arith.constant 0 : index
    %4 = vector.load %arg3[%c0_4, %c0_5] : memref<32x96xf32, #tpu.memory_space<vmem>>, vector<32x96xf32>
    %cst_6 = arith.constant dense<0.000000e+00> : vector<16x96xf32>
    %5 = tpu.matmul %0, %4, %cst_6 {dimension_numbers = #tpu.dot_dimension_numbers<[1], [0], [0], [1], [0, 0, 1, 1], [], []>} : vector<16x32xf32>, vector<32x96xf32>, vector<16x96xf32> -> vector<16x96xf32>
    %c0_7 = arith.constant 0 : index
    %c0_8 = arith.constant 0 : index
    %6 = vector.load %arg4[%c0_7, %c0_8] : memref<1x96xf32, #tpu.memory_space<vmem>>, vector<1x96xf32>
    %7 = vector.broadcast %6 : vector<1x96xf32> to vector<16x96xf32>
    %8 = arith.addf %5, %7 : vector<16x96xf32>
    %9 = vector.extract_strided_slice %8 {offsets = [0, 0], sizes = [16, 8], strides = [1, 1]} : vector<16x96xf32> to vector<16x8xf32>
    %10 = vector.shape_cast %9 : vector<16x8xf32> to vector<2x8x8xf32>
    %11 = vector.extract_strided_slice %8 {offsets = [0, 32], sizes = [16, 8], strides = [1, 1]} : vector<16x96xf32> to vector<16x8xf32>
    %12 = vector.shape_cast %11 : vector<16x8xf32> to vector<2x8x8xf32>
    %13 = vector.extract_strided_slice %8 {offsets = [0, 64], sizes = [16, 8], strides = [1, 1]} : vector<16x96xf32> to vector<16x8xf32>
    %14 = vector.shape_cast %13 : vector<16x8xf32> to vector<2x8x8xf32>
    "tpu.trace_start"() <{level = 10 : i32, message = "bqd,bkd->bqk"}> : () -> ()
    %cst_9 = arith.constant dense<0.000000e+00> : vector<2x8x8xf32>
    %15 = tpu.matmul %10, %12, %cst_9 {dimension_numbers = #tpu.dot_dimension_numbers<[2], [2], [1], [1], [0, 0, 0, 1, 1, 1], [0], [0]>} : vector<2x8x8xf32>, vector<2x8x8xf32>, vector<2x8x8xf32> -> vector<2x8x8xf32>
    %cst_10 = arith.constant -1.000000e+09 : f32
    "tpu.trace_stop"() : () -> ()
    %16 = vector.shape_cast %3 : vector<2x1x8xi1> to vector<2x1x8xi1>
    %17 = vector.broadcast %16 : vector<2x1x8xi1> to vector<2x8x8xi1>
    %18 = vector.broadcast %cst_10 : f32 to vector<2x8x8xf32>
    %19 = arith.select %17, %18, %15 : vector<2x8x8xi1>, vector<2x8x8xf32>
    %cst_11 = arith.constant dense<0xFF800000> : vector<2x8xf32>
    %20 = vector.multi_reduction <maximumf>, %19, %cst_11 [2] : vector<2x8x8xf32> to vector<2x8xf32>
    %21 = vector.shape_cast %20 : vector<2x8xf32> to vector<2x8x1xf32>
    %22 = vector.broadcast %21 : vector<2x8x1xf32> to vector<2x8x8xf32>
    %23 = arith.subf %19, %22 : vector<2x8x8xf32>
    %24 = math.exp %23 : vector<2x8x8xf32>
    %cst_12 = arith.constant dense<0.000000e+00> : vector<2x8xf32>
    %25 = vector.multi_reduction <add>, %24, %cst_12 [2] : vector<2x8x8xf32> to vector<2x8xf32>
    %26 = vector.shape_cast %25 : vector<2x8xf32> to vector<2x8x1xf32>
    %27 = tpu.reciprocal %26 {approx = true} : vector<2x8x1xf32> -> vector<2x8x1xf32>
    %28 = vector.broadcast %27 : vector<2x8x1xf32> to vector<2x8x8xf32>
    %29 = arith.mulf %24, %28 : vector<2x8x8xf32>
    "tpu.trace_start"() <{level = 10 : i32, message = "bqk,bkd->bqd"}> : () -> ()
    %cst_13 = arith.constant dense<0.000000e+00> : vector<2x8x8xf32>
    %30 = tpu.matmul %29, %14, %cst_13 {dimension_numbers = #tpu.dot_dimension_numbers<[2], [1], [1], [2], [0, 0, 0, 1, 1, 2], [0], [0]>} : vector<2x8x8xf32>, vector<2x8x8xf32>, vector<2x8x8xf32> -> vector<2x8x8xf32>
    "tpu.trace_stop"() : () -> ()
    %31 = vector.shape_cast %30 : vector<2x8x8xf32> to vector<16x8xf32>
    %32 = vector.extract_strided_slice %8 {offsets = [0, 8], sizes = [16, 8], strides = [1, 1]} : vector<16x96xf32> to vector<16x8xf32>
    %33 = vector.shape_cast %32 : vector<16x8xf32> to vector<2x8x8xf32>
    %34 = vector.extract_strided_slice %8 {offsets = [0, 40], sizes = [16, 8], strides = [1, 1]} : vector<16x96xf32> to vector<16x8xf32>
    %35 = vector.shape_cast %34 : vector<16x8xf32> to vector<2x8x8xf32>
    %36 = vector.extract_strided_slice %8 {offsets = [0, 72], sizes = [16, 8], strides = [1, 1]} : vector<16x96xf32> to vector<16x8xf32>
    %37 = vector.shape_cast %36 : vector<16x8xf32> to vector<2x8x8xf32>
    "tpu.trace_start"() <{level = 10 : i32, message = "bqd,bkd->bqk"}> : () -> ()
    %cst_14 = arith.constant dense<0.000000e+00> : vector<2x8x8xf32>
    %38 = tpu.matmul %33, %35, %cst_14 {dimension_numbers = #tpu.dot_dimension_numbers<[2], [2], [1], [1], [0, 0, 0, 1, 1, 1], [0], [0]>} : vector<2x8x8xf32>, vector<2x8x8xf32>, vector<2x8x8xf32> -> vector<2x8x8xf32>
    %cst_15 = arith.constant -1.000000e+09 : f32
    "tpu.trace_stop"() : () -> ()
    %39 = vector.shape_cast %3 : vector<2x1x8xi1> to vector<2x1x8xi1>
    %40 = vector.broadcast %39 : vector<2x1x8xi1> to vector<2x8x8xi1>
    %41 = vector.broadcast %cst_15 : f32 to vector<2x8x8xf32>
    %42 = arith.select %40, %41, %38 : vector<2x8x8xi1>, vector<2x8x8xf32>
    %cst_16 = arith.constant dense<0xFF800000> : vector<2x8xf32>
    %43 = vector.multi_reduction <maximumf>, %42, %cst_16 [2] : vector<2x8x8xf32> to vector<2x8xf32>
    %44 = vector.shape_cast %43 : vector<2x8xf32> to vector<2x8x1xf32>
    %45 = vector.broadcast %44 : vector<2x8x1xf32> to vector<2x8x8xf32>
    %46 = arith.subf %42, %45 : vector<2x8x8xf32>
    %47 = math.exp %46 : vector<2x8x8xf32>
    %cst_17 = arith.constant dense<0.000000e+00> : vector<2x8xf32>
    %48 = vector.multi_reduction <add>, %47, %cst_17 [2] : vector<2x8x8xf32> to vector<2x8xf32>
    %49 = vector.shape_cast %48 : vector<2x8xf32> to vector<2x8x1xf32>
    %50 = tpu.reciprocal %49 {approx = true} : vector<2x8x1xf32> -> vector<2x8x1xf32>
    %51 = vector.broadcast %50 : vector<2x8x1xf32> to vector<2x8x8xf32>
    %52 = arith.mulf %47, %51 : vector<2x8x8xf32>
    "tpu.trace_start"() <{level = 10 : i32, message = "bqk,bkd->bqd"}> : () -> ()
    %cst_18 = arith.constant dense<0.000000e+00> : vector<2x8x8xf32>
    %53 = tpu.matmul %52, %37, %cst_18 {dimension_numbers = #tpu.dot_dimension_numbers<[2], [1], [1], [2], [0, 0, 0, 1, 1, 2], [0], [0]>} : vector<2x8x8xf32>, vector<2x8x8xf32>, vector<2x8x8xf32> -> vector<2x8x8xf32>
    "tpu.trace_stop"() : () -> ()
    %54 = vector.shape_cast %53 : vector<2x8x8xf32> to vector<16x8xf32>
    %55 = vector.extract_strided_slice %8 {offsets = [0, 16], sizes = [16, 8], strides = [1, 1]} : vector<16x96xf32> to vector<16x8xf32>
    %56 = vector.shape_cast %55 : vector<16x8xf32> to vector<2x8x8xf32>
    %57 = vector.extract_strided_slice %8 {offsets = [0, 48], sizes = [16, 8], strides = [1, 1]} : vector<16x96xf32> to vector<16x8xf32>
    %58 = vector.shape_cast %57 : vector<16x8xf32> to vector<2x8x8xf32>
    %59 = vector.extract_strided_slice %8 {offsets = [0, 80], sizes = [16, 8], strides = [1, 1]} : vector<16x96xf32> to vector<16x8xf32>
    %60 = vector.shape_cast %59 : vector<16x8xf32> to vector<2x8x8xf32>
    "tpu.trace_start"() <{level = 10 : i32, message = "bqd,bkd->bqk"}> : () -> ()
    %cst_19 = arith.constant dense<0.000000e+00> : vector<2x8x8xf32>
    %61 = tpu.matmul %56, %58, %cst_19 {dimension_numbers = #tpu.dot_dimension_numbers<[2], [2], [1], [1], [0, 0, 0, 1, 1, 1], [0], [0]>} : vector<2x8x8xf32>, vector<2x8x8xf32>, vector<2x8x8xf32> -> vector<2x8x8xf32>
    %cst_20 = arith.constant -1.000000e+09 : f32
    "tpu.trace_stop"() : () -> ()
    %62 = vector.shape_cast %3 : vector<2x1x8xi1> to vector<2x1x8xi1>
    %63 = vector.broadcast %62 : vector<2x1x8xi1> to vector<2x8x8xi1>
    %64 = vector.broadcast %cst_20 : f32 to vector<2x8x8xf32>
    %65 = arith.select %63, %64, %61 : vector<2x8x8xi1>, vector<2x8x8xf32>
    %cst_21 = arith.constant dense<0xFF800000> : vector<2x8xf32>
    %66 = vector.multi_reduction <maximumf>, %65, %cst_21 [2] : vector<2x8x8xf32> to vector<2x8xf32>
    %67 = vector.shape_cast %66 : vector<2x8xf32> to vector<2x8x1xf32>
    %68 = vector.broadcast %67 : vector<2x8x1xf32> to vector<2x8x8xf32>
    %69 = arith.subf %65, %68 : vector<2x8x8xf32>
    %70 = math.exp %69 : vector<2x8x8xf32>
    %cst_22 = arith.constant dense<0.000000e+00> : vector<2x8xf32>
    %71 = vector.multi_reduction <add>, %70, %cst_22 [2] : vector<2x8x8xf32> to vector<2x8xf32>
    %72 = vector.shape_cast %71 : vector<2x8xf32> to vector<2x8x1xf32>
    %73 = tpu.reciprocal %72 {approx = true} : vector<2x8x1xf32> -> vector<2x8x1xf32>
    %74 = vector.broadcast %73 : vector<2x8x1xf32> to vector<2x8x8xf32>
    %75 = arith.mulf %70, %74 : vector<2x8x8xf32>
    "tpu.trace_start"() <{level = 10 : i32, message = "bqk,bkd->bqd"}> : () -> ()
    %cst_23 = arith.constant dense<0.000000e+00> : vector<2x8x8xf32>
    %76 = tpu.matmul %75, %60, %cst_23 {dimension_numbers = #tpu.dot_dimension_numbers<[2], [1], [1], [2], [0, 0, 0, 1, 1, 2], [0], [0]>} : vector<2x8x8xf32>, vector<2x8x8xf32>, vector<2x8x8xf32> -> vector<2x8x8xf32>
    "tpu.trace_stop"() : () -> ()
    %77 = vector.shape_cast %76 : vector<2x8x8xf32> to vector<16x8xf32>
    %78 = vector.extract_strided_slice %8 {offsets = [0, 24], sizes = [16, 8], strides = [1, 1]} : vector<16x96xf32> to vector<16x8xf32>
    %79 = vector.shape_cast %78 : vector<16x8xf32> to vector<2x8x8xf32>
    %80 = vector.extract_strided_slice %8 {offsets = [0, 56], sizes = [16, 8], strides = [1, 1]} : vector<16x96xf32> to vector<16x8xf32>
    %81 = vector.shape_cast %80 : vector<16x8xf32> to vector<2x8x8xf32>
    %82 = vector.extract_strided_slice %8 {offsets = [0, 88], sizes = [16, 8], strides = [1, 1]} : vector<16x96xf32> to vector<16x8xf32>
    %83 = vector.shape_cast %82 : vector<16x8xf32> to vector<2x8x8xf32>
    "tpu.trace_start"() <{level = 10 : i32, message = "bqd,bkd->bqk"}> : () -> ()
    %cst_24 = arith.constant dense<0.000000e+00> : vector<2x8x8xf32>
    %84 = tpu.matmul %79, %81, %cst_24 {dimension_numbers = #tpu.dot_dimension_numbers<[2], [2], [1], [1], [0, 0, 0, 1, 1, 1], [0], [0]>} : vector<2x8x8xf32>, vector<2x8x8xf32>, vector<2x8x8xf32> -> vector<2x8x8xf32>
    %cst_25 = arith.constant -1.000000e+09 : f32
    "tpu.trace_stop"() : () -> ()
    %85 = vector.shape_cast %3 : vector<2x1x8xi1> to vector<2x1x8xi1>
    %86 = vector.broadcast %85 : vector<2x1x8xi1> to vector<2x8x8xi1>
    %87 = vector.broadcast %cst_25 : f32 to vector<2x8x8xf32>
    %88 = arith.select %86, %87, %84 : vector<2x8x8xi1>, vector<2x8x8xf32>
    %cst_26 = arith.constant dense<0xFF800000> : vector<2x8xf32>
    %89 = vector.multi_reduction <maximumf>, %88, %cst_26 [2] : vector<2x8x8xf32> to vector<2x8xf32>
    %90 = vector.shape_cast %89 : vector<2x8xf32> to vector<2x8x1xf32>
    %91 = vector.broadcast %90 : vector<2x8x1xf32> to vector<2x8x8xf32>
    %92 = arith.subf %88, %91 : vector<2x8x8xf32>
    %93 = math.exp %92 : vector<2x8x8xf32>
    %cst_27 = arith.constant dense<0.000000e+00> : vector<2x8xf32>
    %94 = vector.multi_reduction <add>, %93, %cst_27 [2] : vector<2x8x8xf32> to vector<2x8xf32>
    %95 = vector.shape_cast %94 : vector<2x8xf32> to vector<2x8x1xf32>
    %96 = tpu.reciprocal %95 {approx = true} : vector<2x8x1xf32> -> vector<2x8x1xf32>
    %97 = vector.broadcast %96 : vector<2x8x1xf32> to vector<2x8x8xf32>
    %98 = arith.mulf %93, %97 : vector<2x8x8xf32>
    "tpu.trace_start"() <{level = 10 : i32, message = "bqk,bkd->bqd"}> : () -> ()
    %cst_28 = arith.constant dense<0.000000e+00> : vector<2x8x8xf32>
    %99 = tpu.matmul %98, %83, %cst_28 {dimension_numbers = #tpu.dot_dimension_numbers<[2], [1], [1], [2], [0, 0, 0, 1, 1, 2], [0], [0]>} : vector<2x8x8xf32>, vector<2x8x8xf32>, vector<2x8x8xf32> -> vector<2x8x8xf32>
    "tpu.trace_stop"() : () -> ()
    %100 = vector.shape_cast %99 : vector<2x8x8xf32> to vector<16x8xf32>
    %101 = tpu.concatenate %31, %54, %77, %100 in 1 : vector<16x8xf32>, vector<16x8xf32>, vector<16x8xf32>, vector<16x8xf32> -> vector<16x32xf32>
    %c0_29 = arith.constant 0 : index
    %c0_30 = arith.constant 0 : index
    %102 = vector.load %arg5[%c0_29, %c0_30] : memref<32x32xf32, #tpu.memory_space<vmem>>, vector<32x32xf32>
    %cst_31 = arith.constant dense<0.000000e+00> : vector<16x32xf32>
    %103 = tpu.matmul %101, %102, %cst_31 {dimension_numbers = #tpu.dot_dimension_numbers<[1], [0], [0], [1], [0, 0, 1, 1], [], []>} : vector<16x32xf32>, vector<32x32xf32>, vector<16x32xf32> -> vector<16x32xf32>
    %c0_32 = arith.constant 0 : index
    %c0_33 = arith.constant 0 : index
    %104 = vector.load %arg6[%c0_32, %c0_33] : memref<1x32xf32, #tpu.memory_space<vmem>>, vector<1x32xf32>
    %105 = vector.broadcast %104 : vector<1x32xf32> to vector<16x32xf32>
    %106 = arith.addf %103, %105 : vector<16x32xf32>
    %107 = arith.addf %0, %106 : vector<16x32xf32>
    %cst_34 = arith.constant dense<0.000000e+00> : vector<16xf32>
    %108 = vector.multi_reduction <add>, %107, %cst_34 [1] : vector<16x32xf32> to vector<16xf32>
    %109 = vector.shape_cast %108 : vector<16xf32> to vector<16x1xf32>
    %cst_35 = arith.constant 3.200000e+01 : f32
    %110 = vector.broadcast %cst_35 : f32 to vector<16x1xf32>
    %111 = arith.divf %109, %110 : vector<16x1xf32>
    %112 = vector.broadcast %111 : vector<16x1xf32> to vector<16x32xf32>
    %113 = arith.subf %107, %112 : vector<16x32xf32>
    %114 = arith.mulf %113, %113 : vector<16x32xf32>
    %cst_36 = arith.constant dense<0.000000e+00> : vector<16xf32>
    %115 = vector.multi_reduction <add>, %114, %cst_36 [1] : vector<16x32xf32> to vector<16xf32>
    %116 = vector.shape_cast %115 : vector<16xf32> to vector<16x1xf32>
    %cst_37 = arith.constant 3.200000e+01 : f32
    %117 = vector.broadcast %cst_37 : f32 to vector<16x1xf32>
    %118 = arith.divf %116, %117 : vector<16x1xf32>
    %119 = vector.broadcast %111 : vector<16x1xf32> to vector<16x32xf32>
    %120 = arith.subf %107, %119 : vector<16x32xf32>
    %cst_38 = arith.constant 9.99999974E-6 : f32
    %121 = vector.broadcast %cst_38 : f32 to vector<16x1xf32>
    %122 = arith.addf %118, %121 : vector<16x1xf32>
    %123 = math.rsqrt %122 : vector<16x1xf32>
    %124 = vector.broadcast %123 : vector<16x1xf32> to vector<16x32xf32>
    %125 = arith.mulf %120, %124 : vector<16x32xf32>
    %c0_39 = arith.constant 0 : index
    %c0_40 = arith.constant 0 : index
    %126 = vector.load %arg7[%c0_39, %c0_40] : memref<1x32xf32, #tpu.memory_space<vmem>>, vector<1x32xf32>
    %127 = vector.broadcast %126 : vector<1x32xf32> to vector<16x32xf32>
    %128 = arith.mulf %125, %127 : vector<16x32xf32>
    %c0_41 = arith.constant 0 : index
    %c0_42 = arith.constant 0 : index
    %129 = vector.load %arg8[%c0_41, %c0_42] : memref<1x32xf32, #tpu.memory_space<vmem>>, vector<1x32xf32>
    %130 = vector.broadcast %129 : vector<1x32xf32> to vector<16x32xf32>
    %131 = arith.addf %128, %130 : vector<16x32xf32>
    %c0_43 = arith.constant 0 : index
    %c0_44 = arith.constant 0 : index
    %132 = vector.load %arg9[%c0_43, %c0_44] : memref<32x64xf32, #tpu.memory_space<vmem>>, vector<32x64xf32>
    %cst_45 = arith.constant dense<0.000000e+00> : vector<16x64xf32>
    %133 = tpu.matmul %131, %132, %cst_45 {dimension_numbers = #tpu.dot_dimension_numbers<[1], [0], [0], [1], [0, 0, 1, 1], [], []>} : vector<16x32xf32>, vector<32x64xf32>, vector<16x64xf32> -> vector<16x64xf32>
    %c0_46 = arith.constant 0 : index
    %c0_47 = arith.constant 0 : index
    %134 = vector.load %arg10[%c0_46, %c0_47] : memref<1x64xf32, #tpu.memory_space<vmem>>, vector<1x64xf32>
    %135 = vector.broadcast %134 : vector<1x64xf32> to vector<16x64xf32>
    %136 = arith.addf %133, %135 : vector<16x64xf32>
    %cst_48 = arith.constant 0.000000e+00 : f32
    %137 = vector.broadcast %cst_48 : f32 to vector<16x64xf32>
    %138 = arith.maximumf %136, %137 : vector<16x64xf32>
    %c0_49 = arith.constant 0 : index
    %c0_50 = arith.constant 0 : index
    %139 = vector.load %arg11[%c0_49, %c0_50] : memref<64x32xf32, #tpu.memory_space<vmem>>, vector<64x32xf32>
    %cst_51 = arith.constant dense<0.000000e+00> : vector<16x32xf32>
    %140 = tpu.matmul %138, %139, %cst_51 {dimension_numbers = #tpu.dot_dimension_numbers<[1], [0], [0], [1], [0, 0, 1, 1], [], []>} : vector<16x64xf32>, vector<64x32xf32>, vector<16x32xf32> -> vector<16x32xf32>
    %c0_52 = arith.constant 0 : index
    %c0_53 = arith.constant 0 : index
    %141 = vector.load %arg12[%c0_52, %c0_53] : memref<1x32xf32, #tpu.memory_space<vmem>>, vector<1x32xf32>
    %142 = vector.broadcast %141 : vector<1x32xf32> to vector<16x32xf32>
    %143 = arith.addf %140, %142 : vector<16x32xf32>
    %144 = arith.addf %131, %143 : vector<16x32xf32>
    %cst_54 = arith.constant dense<0.000000e+00> : vector<16xf32>
    %145 = vector.multi_reduction <add>, %144, %cst_54 [1] : vector<16x32xf32> to vector<16xf32>
    %146 = vector.shape_cast %145 : vector<16xf32> to vector<16x1xf32>
    %cst_55 = arith.constant 3.200000e+01 : f32
    %147 = vector.broadcast %cst_55 : f32 to vector<16x1xf32>
    %148 = arith.divf %146, %147 : vector<16x1xf32>
    %149 = vector.broadcast %148 : vector<16x1xf32> to vector<16x32xf32>
    %150 = arith.subf %144, %149 : vector<16x32xf32>
    %151 = arith.mulf %150, %150 : vector<16x32xf32>
    %cst_56 = arith.constant dense<0.000000e+00> : vector<16xf32>
    %152 = vector.multi_reduction <add>, %151, %cst_56 [1] : vector<16x32xf32> to vector<16xf32>
    %153 = vector.shape_cast %152 : vector<16xf32> to vector<16x1xf32>
    %cst_57 = arith.constant 3.200000e+01 : f32
    %154 = vector.broadcast %cst_57 : f32 to vector<16x1xf32>
    %155 = arith.divf %153, %154 : vector<16x1xf32>
    %156 = vector.broadcast %148 : vector<16x1xf32> to vector<16x32xf32>
    %157 = arith.subf %144, %156 : vector<16x32xf32>
    %cst_58 = arith.constant 9.99999974E-6 : f32
    %158 = vector.broadcast %cst_58 : f32 to vector<16x1xf32>
    %159 = arith.addf %155, %158 : vector<16x1xf32>
    %160 = math.rsqrt %159 : vector<16x1xf32>
    %161 = vector.broadcast %160 : vector<16x1xf32> to vector<16x32xf32>
    %162 = arith.mulf %157, %161 : vector<16x32xf32>
    %c0_59 = arith.constant 0 : index
    %c0_60 = arith.constant 0 : index
    %163 = vector.load %arg13[%c0_59, %c0_60] : memref<1x32xf32, #tpu.memory_space<vmem>>, vector<1x32xf32>
    %164 = vector.broadcast %163 : vector<1x32xf32> to vector<16x32xf32>
    %165 = arith.mulf %162, %164 : vector<16x32xf32>
    %c0_61 = arith.constant 0 : index
    %c0_62 = arith.constant 0 : index
    %166 = vector.load %arg14[%c0_61, %c0_62] : memref<1x32xf32, #tpu.memory_space<vmem>>, vector<1x32xf32>
    %167 = vector.broadcast %166 : vector<1x32xf32> to vector<16x32xf32>
    %168 = arith.addf %165, %167 : vector<16x32xf32>
    %c0_63 = arith.constant 0 : index
    %c0_64 = arith.constant 0 : index
    %169 = vector.load %arg15[%c0_63, %c0_64] : memref<16x32xf32, #tpu.memory_space<vmem>>, vector<16x32xf32>
    tpu.vector_store %arg15[%c0_63, %c0_64], %168 {strides = array<i32>} : memref<16x32xf32, #tpu.memory_space<vmem>>, vector<16x32xf32>,
    return
  }
  func.func @transform_0(%arg0: i32) -> (i32, i32) {
    %c0_i32 = arith.constant 0 : i32
    %c0_i32_0 = arith.constant 0 : i32
    %c0_i32_1 = arith.constant 0 : i32
    return %c0_i32, %c0_i32_0 : i32, i32
  }
  func.func @transform_1(%arg0: i32) -> (i32, i32, i32) {
    %c0_i32 = arith.constant 0 : i32
    %c0_i32_0 = arith.constant 0 : i32
    %c0_i32_1 = arith.constant 0 : i32
    %c0_i32_2 = arith.constant 0 : i32
    return %c0_i32, %c0_i32_0, %c0_i32_1 : i32, i32, i32
  }
  func.func @transform_2(%arg0: i32) -> (i32, i32) {
    %c0_i32 = arith.constant 0 : i32
    %c0_i32_0 = arith.constant 0 : i32
    %c0_i32_1 = arith.constant 0 : i32
    return %c0_i32, %c0_i32_0 : i32, i32
  }
  func.func @transform_3(%arg0: i32) -> (i32, i32) {
    %c0_i32 = arith.constant 0 : i32
    %c0_i32_0 = arith.constant 0 : i32
    %c0_i32_1 = arith.constant 0 : i32
    return %c0_i32, %c0_i32_0 : i32, i32
  }
  func.func @transform_4(%arg0: i32) -> (i32, i32) {
    %c0_i32 = arith.constant 0 : i32
    %c0_i32_0 = arith.constant 0 : i32
    %c0_i32_1 = arith.constant 0 : i32
    return %c0_i32, %c0_i32_0 : i32, i32
  }
  func.func @transform_5(%arg0: i32) -> (i32, i32) {
    %c0_i32 = arith.constant 0 : i32
    %c0_i32_0 = arith.constant 0 : i32
    %c0_i32_1 = arith.constant 0 : i32
    return %c0_i32, %c0_i32_0 : i32, i32
  }
  func.func @transform_6(%arg0: i32) -> (i32, i32) {
    %c0_i32 = arith.constant 0 : i32
    %c0_i32_0 = arith.constant 0 : i32
    %c0_i32_1 = arith.constant 0 : i32
    return %c0_i32, %c0_i32_0 : i32, i32
  }
  func.func @transform_7(%arg0: i32) -> (i32, i32) {
    %c0_i32 = arith.constant 0 : i32
    %c0_i32_0 = arith.constant 0 : i32
    %c0_i32_1 = arith.constant 0 : i32
    return %c0_i32, %c0_i32_0 : i32, i32
  }
  func.func @transform_8(%arg0: i32) -> (i32, i32) {
    %c0_i32 = arith.constant 0 : i32
    %c0_i32_0 = arith.constant 0 : i32
    %c0_i32_1 = arith.constant 0 : i32
    return %c0_i32, %c0_i32_0 : i32, i32
  }
  func.func @transform_9(%arg0: i32) -> (i32, i32) {
    %c0_i32 = arith.constant 0 : i32
    %c0_i32_0 = arith.constant 0 : i32
    %c0_i32_1 = arith.constant 0 : i32
    return %c0_i32, %c0_i32_0 : i32, i32
  }
  func.func @transform_10(%arg0: i32) -> (i32, i32) {
    %c0_i32 = arith.constant 0 : i32
    %c0_i32_0 = arith.constant 0 : i32
    %c0_i32_1 = arith.constant 0 : i32
    return %c0_i32, %c0_i32_0 : i32, i32
  }
  func.func @transform_11(%arg0: i32) -> (i32, i32) {
    %c0_i32 = arith.constant 0 : i32
    %c0_i32_0 = arith.constant 0 : i32
    %c0_i32_1 = arith.constant 0 : i32
    return %c0_i32, %c0_i32_0 : i32, i32
  }
  func.func @transform_12(%arg0: i32) -> (i32, i32) {
    %c0_i32 = arith.constant 0 : i32
    %c0_i32_0 = arith.constant 0 : i32
    %c0_i32_1 = arith.constant 0 : i32
    return %c0_i32, %c0_i32_0 : i32, i32
  }
  func.func @transform_13(%arg0: i32) -> (i32, i32) {
    %c0_i32 = arith.constant 0 : i32
    %c0_i32_0 = arith.constant 0 : i32
    %c0_i32_1 = arith.constant 0 : i32
    return %c0_i32, %c0_i32_0 : i32, i32
  }
  func.func @transform_14(%arg0: i32) -> (i32, i32) {
    %c0_i32 = arith.constant 0 : i32
    %c0_i32_0 = arith.constant 0 : i32
    %c0_i32_1 = arith.constant 0 : i32
    return %c0_i32, %c0_i32_0 : i32, i32
  }
}

</mosaic_0001>

<bundles_post_ra>
// kernel: encoder_layer.1
= control target key start
LH: loop header
LB: loop body
LE: loop exit
PB: predicated region body
PF: predicated region fallthrough
CT: control target
= control target key end

     0   :  { %19 = vsyncpa [#allocation3], 0  ;;  %s2700_s0 = inlined_call_operand.hbm [shape: f32[16,32], index: 0, kind: input, shape index: {}]   ;;  %s2701_s1 = inlined_call_operand.vmem [shape: f32[2,1,8], index: 1, kind: input, shape index: {}]   ;;  %s2702_s2 = inlined_call_operand.vmem [shape: f32[32,96], index: 2, kind: input, shape index: {}]   ;;  %s2703_s3 = inlined_call_operand.vmem [shape: f32[1,96], index: 3, kind: input, shape index: {}]   ;;  %s2704_s4 = inlined_call_operand.vmem [shape: f32[32,32], index: 4, kind: input, shape index: {}]   ;;  %s2705_s5 = inlined_call_operand.vmem [shape: f32[1,32], index: 5, kind: input, shape index: {}]   ;;  %s2706_s6 = inlined_call_operand.vmem [shape: f32[1,32], index: 6, kind: input, shape index: {}]   ;;  %s2707_s7 = inlined_call_operand.vmem [shape: f32[1,32], index: 7, kind: input, shape index: {}]   ;;  %s2708_s8 = inlined_call_operand.vmem [shape: f32[32,64], index: 8, kind: input, shape index: {}]   ;;  %s2709_s9 = inlined_call_operand.vmem [shape: f32[1,64], index: 9, kind: input, shape index: {}]   ;;  %s2710_s10 = inlined_call_operand.vmem [shape: f32[64,32], index: 10, kind: input, shape index: {}]   ;;  %s2711_s11 = inlined_call_operand.vmem [shape: f32[1,32], index: 11, kind: input, shape index: {}]   ;;  %s2712_s12 = inlined_call_operand.vmem [shape: f32[1,32], index: 12, kind: input, shape index: {}]   ;;  %s2713_s13 = inlined_call_operand.vmem [shape: f32[1,32], index: 13, kind: input, shape index: {}]   ;;  %s2714_s14 = inlined_call_operand.hbm [shape: f32[16,32], index: 14, kind: output, shape index: {}]  }
   0x1   :  { %20 = vsyncpa [#allocation4], 0  ;;  %s2307_s29 = smov [#allocation2]   ;;  %s2259_s17 = scalar_lea.hbm %s2700_s0, 256 }
   0x2   :  { %s26_s30 = sshll.u32 %s2307_s29, 4  ;;  %p2260_p0 = scmp.ne.s32.totalorder %s2700_s0, %s2259_s17  ;;  %s27_s30 = int_to_ptr.vmem [resolvable:$true] %s26_s30 }
   0x3   :  { %p2263_p1 = scmp.lt.u32.totalorder %s2259_s17, %s2700_s0 }
   0x5   :  { %p2265_p2 = pnand %p2263_p1, %p2260_p0 }
   0x7   :  { %2268 = shalt.err (!%p2265_p2)
}
   0x8   :  { %s2269_s22 = scalar_lea.vmem %s27_s30, 256  ;;  %p2274_p4 = scmp.lt.s32.totalorder %s27_s30, %s27_s30 }
   0x9   :  { %p2270_p3 = scmp.ne.s32.totalorder %s27_s30, %s2269_s22  ;;  %p2275_p5 = scmp.lt.s32.totalorder %s2269_s22, %s2269_s22 }
   0xb   :  { %p2276_p6 = por %p2275_p5, %p2274_p4 }
   0xd   :  { %p2277_p7 = pnand %p2276_p6, %p2270_p3 }
   0xf   :  { %2280 = shalt.err (!%p2277_p7)
}
  0x10   :  { %s2308_s23 = smov 128   ;;  %s2309_s24 = smov 8  }
  0x11   :  { %32 = dma.hbm_to_vmem [thread:$0]  %s2700_s0, 256, %s27_s30, [#allocation3], %s2308_s23, %s2308_s23, %s2309_s24  }
  0x12   :  { %2303 = dma.done.wait [#allocation3], 256  }
  0x13   :  { %2304 = vsyncadd [#allocation3], 4294967040  ;;  %vm79_vm0 = vcmask 261120   ;;  %v68_v0 = vld [vmem:[%s2702_s2] sm:$0xff]  ;;  %v69_v1 = vld [vmem:[%s2702_s2 + $0x8] sm:$0xff]  ;;  %v2310_v8 = vmov 0.0   ;;  %v318_v16 = vlaneseq }
  0x14   :  { %v70_v2 = vld [vmem:[%s2702_s2 + $0x10] sm:$0xff]  ;;  %v2159_v3 = vpack.c.bf16 %v69_v1, %v68_v0  ;;  %v71_v4 = vld [vmem:[%s2702_s2 + $0x18] sm:$0xff]  ;;  %v2429_v5 = vld [vmem:[#allocation2] sm:$0xff]  ;;  %2048 = vmatprep.subr.mxu0 %v2310_v8  ;;  %vm2311_vm1 = vmmov 0   ;;  %s2312_s30 = smov 96   ;;  %vm164_vm2 = vcmask 64512  }
  0x15   :  { %v2163_v6 = vpack.c.bf16 %v71_v4, %v70_v2  ;;  %2035 = vmatprep.mubr.msk.f32.mxu1 %vm79_vm0, %v2429_v5  ;;  %v2433_v7 = vld [vmem:[#allocation2 + $0x8] sm:$0xff]  ;;  %2050 = vmatprep.mubr.msk.f32.mxu0 %vm2311_vm1, %v2310_v8  ;;  %v1927_v9 = vld [vmem:[%s2703_s3] ss:$0 sm:$0xff]  ;;  %v319_v18 = vshrl.u32 %v318_v16, 7  ;;  %v65_v19 = vld [vmem:[%s2701_s1 + $0x1] sm:$0x1] }
  0x16   :  { %2160 = vmatprep.subr.bf16.mxu1 %v2159_v3  ;;  %v64_v17 = vld [vmem:[%s2701_s1] sm:$0x1]  ;;  %v2313_v21 = vmov 0   ;;  %vm67_vm4 = vcmp.eq.f32.partialorder %v65_v19, 0.0  ;;  %s2314_s1 = smov 64   ;;  %s2315_s25 = smov 88  }
  0x17   :  { %2162 = vmatpush3.bf16.msra.mxu1 %v2159_v3  ;;  %vm66_vm3 = vcmp.eq.f32.partialorder %v64_v17, 0.0  ;;  %v320_v20 = vsub.s32 0, %v319_v18  ;;  %v317_v24 = vsel %vm67_vm4, 1, %v2313_v21  ;;  %s2316_s26 = smov 120   ;;  %s2317_s27 = smov 56   ;;  %vm1529_vm7 = vcmask 195584  }
  0x18   :  { %2164 = vmatprep.subr.bf16.mxu1 %v2163_v6  ;;  %v316_v22 = vsel %vm66_vm3, 1, %v2313_v21  ;;  %s2318_s28 = smov 80   ;;  %s2319_s29 = smov 112   ;;  %vm1526_vm8 = vcmask 130048   ;;  %vm1780_vm9 = vcmask 523264  }
  0x19   :  { %v2470_v23 = vrot.slane %v316_v22, %v320_v20  ;;  %v2473_v25 = vrot.slane %v317_v24, %v320_v20  ;;  %s2320_s15 = smov 48   ;;  %s2321_s16 = smov 72  }
  0x1a   :  { %s2322_s17 = smov 104   ;;  %s2323_s18 = smov 40  }
  0x1b   :  { %2166 = vmatpush3.bf16.msra.mxu1 %v2163_v6  ;;  %vm326_vm5 = vcmp.eq.s32.totalorder %v2470_v23, 1  ;;  %vm327_vm6 = vcmp.eq.s32.totalorder %v2473_v25, 1  ;;  %s2324_s19 = smov 16   ;;  %s2326_s2 = smov [#allocation5]  }
  0x1c   :  { %2038 = vmatprep.subr.mxu1 %v2310_v8 }
  0x1e   :  { %2036 = vmatmul.mubr.msk.f32.vlgmr.msra.gmra.mrb[0].mxu1 %vm79_vm0, %v2433_v7 }
  0x1f   :  { %2040 = vmatprep.mubr.msk.f32.mxu1 %vm2311_vm1, %v2310_v8 }
  0xf1   :  { %v2037_v10 = vpop.f32.mrb[0].mxu1 }
  0xf2   :  { %v152_v11 = vpop.f32.mrb[1].mxu1  ;;  %v2449_v13 = vadd.f32 %v2037_v10, %v1927_v9 }
  0xf3   :  { %v2446_v12 = vadd.f32 %v1927_v9, %v152_v11 }
  0xf5   :  { %162 = vrot.lane.b32.xlu0 %v2446_v12, %s2312_s30 }
  0xf9   :  { %240 = vrot.lane.b32.xlu0 %v2449_v13, %s2312_s30  ;;  %s1915_s30 = sshll.u32 %s2326_s2, 4  ;;  %s1916_s30 = int_to_ptr.vmem [resolvable:$true] %s1915_s30 }
  0xfa   :  { %s2281_s3 = scalar_lea.vmem %s1916_s30, 256  ;;  %p2286_p9 = scmp.lt.s32.totalorder %s1916_s30, %s1916_s30 }
  0xfb   :  { %p2282_p8 = scmp.ne.s32.totalorder %s1916_s30, %s2281_s3  ;;  %p2287_p10 = scmp.lt.s32.totalorder %s2281_s3, %s2281_s3 }
  0xfd   :  { %p2288_p11 = por %p2287_p10, %p2286_p9 }
  0xff   :  { %p2289_p12 = pnand %p2288_p11, %p2282_p8 }
 0x167   :  { %v163_v14 = vpop.permute.xlu0 %162 }
 0x168   :  { %2039 = vmatpush3.xpose.msk.msra.mxu1 %vm164_vm2, %v163_v14 }
 0x169   :  { %2043 = vmatprep.subr.mxu1 %v2310_v8 }
 0x16b   :  { %2041 = vmatmul.mubr.msk.f32.vlgmr.msra.gmra.mrb[2].mxu1 %vm164_vm2, %v2446_v12  ;;  %v241_v15 = vpop.permute.xlu0 %240 }
 0x16c   :  { %2044 = vmatpush3.xpose.msk.msra.mxu1 %vm164_vm2, %v241_v15  ;;  %2045 = vmatprep.mubr.msk.f32.mxu1 %vm2311_vm1, %v2310_v8 }
 0x16d   :  { %2053 = vmatprep.subr.mxu1 %v2310_v8 }
 0x16f   :  { %2046 = vmatmul.mubr.msk.f32.vlgmr.msra.gmra.mrb[4].mxu1 %vm164_vm2, %v2449_v13 }
 0x170   :  { %2055 = vmatprep.mubr.msk.f32.mxu1 %vm2311_vm1, %v2310_v8 }
 0x23e   :  { %v235_v26 = vpop.f32.mrb[2].mxu1 }
 0x23f   :  { %v328_v27 = vsel %vm326_vm5, -1e+09, %v235_v26  ;;  %v2042_v28 = vpop.f32.mrb[3].mxu1 }
 0x240   :  { %v330_v29 = vsel %vm164_vm2, %v328_v27, -inf }
 0x241   :  { %331 = vmax.xlane.f32.xlu1 %v330_v29 }
 0x242   :  { %v312_v30 = vpop.f32.mrb[4].mxu1 }
 0x243   :  { %v329_v31 = vsel %vm327_vm6, -1e+09, %v312_v30  ;;  %v2047_v32 = vpop.f32.mrb[5].mxu1 }
 0x244   :  { %v333_v33 = vsel %vm164_vm2, %v329_v31, -inf }
 0x245   :  { %334 = vmax.xlane.f32.xlu1 %v333_v33 }
 0x256   :  { %352 = vrot.lane.b32.xlu1 %v2446_v12, %s2314_s1 }
 0x25a   :  { %428 = vrot.lane.b32.xlu1 %v2449_v13, %s2314_s1 }
 0x25e   :  { %506 = vrot.lane.b32.xlu1 %v2446_v12, %s2315_s25 }
 0x262   :  { %584 = vrot.lane.b32.xlu1 %v2449_v13, %s2315_s25  ;;  %s2325_s25 = smov 24  }
 0x2ce   :  { %v332_v34 = vpop.xlane.xlu1 %331 }
 0x2cf   :  { %v336_v35 = vsub.f32 %v328_v27, %v332_v34 }
 0x2d1   :  { %v338_v36 = vmul.f32 1.442695, %v336_v35 }
 0x2d2   :  { %v335_v37 = vpop.xlane.xlu1 %334 }
 0x2d3   :  { %2219 = vpow2.f32 %v338_v36  ;;  %v337_v38 = vsub.f32 %v329_v31, %v335_v37 }
 0x2d5   :  { %v340_v39 = vmul.f32 1.442695, %v337_v38 }
 0x2d6   :  { %v353_v40 = vpop.permute.xlu1 %352 }
 0x2d7   :  { %2221 = vpow2.f32 %v340_v39  ;;  %2049 = vmatpush3.msra.mxu0 %v353_v40 }
 0x2d8   :  { %2058 = vmatprep.subr.mxu0 %v2310_v8 }
 0x2da   :  { %v429_v41 = vpop.permute.xlu1 %428 }
 0x2db   :  { %2054 = vmatpush3.msra.mxu1 %v429_v41 }
 0x2dc   :  { %2063 = vmatprep.subr.mxu1 %v2310_v8 }
 0x2dd   :  { %v2220_v42 = vpop.eup %2219 }
 0x2de   :  { %v342_v43 = vsel %vm164_vm2, %v2220_v42, 0.0  ;;  %v507_v46 = vpop.permute.xlu1 %506 }
 0x2df   :  { %343 = vadd.xlane.f32.xlu0 %v342_v43 }
 0x2e1   :  { %v2222_v44 = vpop.eup %2221 }
 0x2e2   :  { %v345_v45 = vsel %vm164_vm2, %v2222_v44, 0.0  ;;  %v585_v47 = vpop.permute.xlu1 %584 }
 0x2e3   :  { %346 = vadd.xlane.f32.xlu1 %v345_v45 }
 0x2f4   :  { %582 = vrot.lane.b32.xlu1 %v2449_v13, %s2316_s26 }
 0x2f5   :  { %504 = vrot.lane.b32.xlu0 %v2446_v12, %s2316_s26 }
 0x36c   :  { %v344_v48 = vpop.xlane.xlu0 %343 }
 0x36d   :  { %2223 = vrcp.f32 %v344_v48 }
 0x370   :  { %v347_v49 = vpop.xlane.xlu1 %346  ;;  %v505_v54 = vpop.permute.xlu0 %504 }
 0x371   :  { %2225 = vrcp.f32 %v347_v49 }
 0x374   :  { %v583_v55 = vpop.permute.xlu1 %582 }
 0x377   :  { %v2224_v50 = vpop.eup %2223 }
 0x378   :  { %v350_v51 = vmul.f32 %v2224_v50, %v2220_v42 }
 0x37a   :  { %2051 = vmatmul.mubr.msk.f32.vlgmr.msra.gmra.mrb[0].mxu0 %vm164_vm2, %v350_v51 }
 0x37b   :  { %v2226_v52 = vpop.eup %2225  ;;  %2059 = vmatpush3.xpose.msk.msra.mxu0 %vm164_vm2, %v507_v46  ;;  %2060 = vmatprep.mubr.msk.f32.mxu0 %vm2311_vm1, %v2310_v8 }
 0x37c   :  { %v351_v53 = vmul.f32 %v2226_v52, %v2222_v44  ;;  %2068 = vmatprep.subr.mxu0 %v2310_v8 }
 0x37e   :  { %2056 = vmatmul.mubr.msk.f32.vlgmr.msra.gmra.mrb[6].mxu1 %vm164_vm2, %v351_v53  ;;  %2061 = vmatmul.mubr.msk.f32.vlgmr.msra.gmra.mrb[2].mxu0 %vm164_vm2, %v505_v54 }
 0x37f   :  { %2064 = vmatpush3.xpose.msk.msra.mxu1 %vm164_vm2, %v585_v47  ;;  %2065 = vmatprep.mubr.msk.f32.mxu1 %vm2311_vm1, %v2310_v8 }
 0x380   :  { %2073 = vmatprep.subr.mxu1 %v2310_v8  ;;  %2070 = vmatprep.mubr.msk.f32.mxu0 %vm2311_vm1, %v2310_v8 }
 0x382   :  { %2066 = vmatmul.mubr.msk.f32.vlgmr.msra.gmra.mrb[8].mxu1 %vm164_vm2, %v583_v55 }
 0x383   :  { %2075 = vmatprep.mubr.msk.f32.mxu1 %vm2311_vm1, %v2310_v8 }
 0x44d   :  { %v2508_v56 = vpop.f32.mrb[0].mxu0 }
 0x44e   :  { %v2052_v57 = vpop.f32.mrb[1].mxu0 }
 0x451   :  { %v2510_v58 = vpop.f32.mrb[6].mxu1  ;;  %v578_v59 = vpop.f32.mrb[2].mxu0 }
 0x452   :  { %v660_v60 = vsel %vm326_vm5, -1e+09, %v578_v59  ;;  %v2057_v61 = vpop.f32.mrb[7].mxu1  ;;  %v2062_v62 = vpop.f32.mrb[3].mxu0 }
 0x453   :  { %v662_v63 = vsel %vm164_vm2, %v660_v60, -inf }
 0x454   :  { %663 = vmax.xlane.f32.xlu1 %v662_v63 }
 0x455   :  { %v656_v0 = vpop.f32.mrb[8].mxu1 }
 0x456   :  { %v661_v1 = vsel %vm327_vm6, -1e+09, %v656_v0  ;;  %v2067_v2 = vpop.f32.mrb[9].mxu1 }
 0x457   :  { %v665_v3 = vsel %vm164_vm2, %v661_v1, -inf }
 0x458   :  { %666 = vmax.xlane.f32.xlu0 %v665_v3 }
 0x465   :  { %684 = vrot.lane.b32.xlu1 %v2446_v12, %s2317_s27 }
 0x469   :  { %838 = vrot.lane.b32.xlu1 %v2446_v12, %s2318_s28 }
 0x46d   :  { %916 = vrot.lane.b32.xlu1 %v2449_v13, %s2318_s28 }
 0x46e   :  { %760 = vrot.lane.b32.xlu0 %v2449_v13, %s2317_s27 }
 0x472   :  { %836 = vrot.lane.b32.xlu0 %v2446_v12, %s2319_s29 }
 0x4e1   :  { %v664_v4 = vpop.xlane.xlu1 %663 }
 0x4e2   :  { %v668_v6 = vsub.f32 %v660_v60, %v664_v4 }
 0x4e4   :  { %v670_v9 = vmul.f32 1.442695, %v668_v6 }
 0x4e5   :  { %v685_v10 = vpop.permute.xlu1 %684  ;;  %v667_v11 = vpop.xlane.xlu0 %666 }
 0x4e6   :  { %2227 = vpow2.f32 %v670_v9  ;;  %v669_v14 = vsub.f32 %v661_v1, %v667_v11  ;;  %2069 = vmatpush3.msra.mxu0 %v685_v10 }
 0x4e7   :  { %2078 = vmatprep.subr.mxu0 %v2310_v8 }
 0x4e8   :  { %v672_v15 = vmul.f32 1.442695, %v669_v14 }
 0x4e9   :  { %v761_v16 = vpop.permute.xlu0 %760  ;;  %v839_v21 = vpop.permute.xlu1 %838 }
 0x4ea   :  { %2229 = vpow2.f32 %v672_v15  ;;  %2074 = vmatpush3.msra.mxu1 %v761_v16 }
 0x4eb   :  { %2083 = vmatprep.subr.mxu1 %v2310_v8 }
 0x4ed   :  { %v917_v22 = vpop.permute.xlu1 %916  ;;  %v837_v31 = vpop.permute.xlu0 %836 }
 0x4f0   :  { %v2228_v17 = vpop.eup %2227 }
 0x4f1   :  { %v674_v18 = vsel %vm164_vm2, %v2228_v17, 0.0 }
 0x4f2   :  { %675 = vadd.xlane.f32.xlu1 %v674_v18 }
 0x4f4   :  { %v2230_v19 = vpop.eup %2229 }
 0x4f5   :  { %v677_v20 = vsel %vm164_vm2, %v2230_v19, 0.0 }
 0x4f6   :  { %678 = vadd.xlane.f32.xlu1 %v677_v20 }
 0x507   :  { %914 = vrot.lane.b32.xlu1 %v2449_v13, %s2319_s29 }
 0x57f   :  { %v676_v24 = vpop.xlane.xlu1 %675 }
 0x580   :  { %2231 = vrcp.f32 %v676_v24 }
 0x583   :  { %v679_v26 = vpop.xlane.xlu1 %678 }
 0x584   :  { %2233 = vrcp.f32 %v679_v26 }
 0x587   :  { %v915_v32 = vpop.permute.xlu1 %914 }
 0x58a   :  { %v2232_v27 = vpop.eup %2231 }
 0x58b   :  { %v682_v28 = vmul.f32 %v2232_v27, %v2228_v17 }
 0x58d   :  { %2071 = vmatmul.mubr.msk.f32.vlgmr.msra.gmra.mrb[4].mxu0 %vm164_vm2, %v682_v28 }
 0x58e   :  { %v2234_v29 = vpop.eup %2233  ;;  %2079 = vmatpush3.xpose.msk.msra.mxu0 %vm164_vm2, %v839_v21  ;;  %2080 = vmatprep.mubr.msk.f32.mxu0 %vm2311_vm1, %v2310_v8 }
 0x58f   :  { %v683_v30 = vmul.f32 %v2234_v29, %v2230_v19  ;;  %2088 = vmatprep.subr.mxu0 %v2310_v8 }
 0x591   :  { %2076 = vmatmul.mubr.msk.f32.vlgmr.msra.gmra.mrb[10].mxu1 %vm164_vm2, %v683_v30  ;;  %2081 = vmatmul.mubr.msk.f32.vlgmr.msra.gmra.mrb[6].mxu0 %vm164_vm2, %v837_v31 }
 0x592   :  { %2084 = vmatpush3.xpose.msk.msra.mxu1 %vm164_vm2, %v917_v22  ;;  %2085 = vmatprep.mubr.msk.f32.mxu1 %vm2311_vm1, %v2310_v8 }
 0x593   :  { %2093 = vmatprep.subr.mxu1 %v2310_v8  ;;  %2090 = vmatprep.mubr.msk.f32.mxu0 %vm2311_vm1, %v2310_v8 }
 0x595   :  { %2086 = vmatmul.mubr.msk.f32.vlgmr.msra.gmra.mrb[12].mxu1 %vm164_vm2, %v915_v32 }
 0x596   :  { %2095 = vmatprep.mubr.msk.f32.mxu1 %vm2311_vm1, %v2310_v8 }
 0x660   :  { %v2544_v33 = vpop.f32.mrb[4].mxu0 }
 0x661   :  { %v2072_v34 = vpop.f32.mrb[5].mxu0 }
 0x664   :  { %v2546_v35 = vpop.f32.mrb[10].mxu1  ;;  %v910_v36 = vpop.f32.mrb[6].mxu0 }
 0x665   :  { %v992_v37 = vsel %vm326_vm5, -1e+09, %v910_v36  ;;  %v2077_v38 = vpop.f32.mrb[11].mxu1  ;;  %v2082_v39 = vpop.f32.mrb[7].mxu0 }
 0x666   :  { %v994_v40 = vsel %vm164_vm2, %v992_v37, -inf  ;;  %v1532_v38 = vld [vmem:[%s2704_s4] sm:$0xff] }
 0x667   :  { %995 = vmax.xlane.f32.xlu0 %v994_v40  ;;  %v1534_v40 = vld [vmem:[%s2704_s4 + $0x10] sm:$0xff] }
 0x668   :  { %v988_v41 = vpop.f32.mrb[12].mxu1 }
 0x669   :  { %v993_v42 = vsel %vm327_vm6, -1e+09, %v988_v41  ;;  %v2087_v43 = vpop.f32.mrb[13].mxu1  ;;  %v1535_v41 = vld [vmem:[%s2704_s4 + $0x18] sm:$0xff] }
 0x66a   :  { %v997_v44 = vsel %vm164_vm2, %v993_v42, -inf }
 0x66b   :  { %998 = vmax.xlane.f32.xlu1 %v997_v44 }
 0x67c   :  { %1016 = vrot.lane.b32.xlu1 %v2446_v12, %s2320_s15 }
 0x67d   :  { %1092 = vrot.lane.b32.xlu0 %v2449_v13, %s2320_s15 }
 0x680   :  { %1170 = vrot.lane.b32.xlu1 %v2446_v12, %s2321_s16 }
 0x684   :  { %1248 = vrot.lane.b32.xlu1 %v2449_v13, %s2321_s16 }
 0x688   :  { %1246 = vrot.lane.b32.xlu1 %v2449_v13, %s2322_s17 }
 0x6f4   :  { %v996_v45 = vpop.xlane.xlu0 %995 }
 0x6f5   :  { %v1000_v46 = vsub.f32 %v992_v37, %v996_v45 }
 0x6f7   :  { %v1002_v47 = vmul.f32 1.442695, %v1000_v46 }
 0x6f8   :  { %v999_v48 = vpop.xlane.xlu1 %998  ;;  %v1093_v49 = vpop.permute.xlu0 %1092 }
 0x6f9   :  { %2235 = vpow2.f32 %v1002_v47  ;;  %v1001_v50 = vsub.f32 %v993_v42, %v999_v48  ;;  %2094 = vmatpush3.msra.mxu1 %v1093_v49  ;;  %v2171_v42 = vpack.c.bf16 %v1535_v41, %v1534_v40 }
 0x6fa   :  { %2103 = vmatprep.subr.mxu1 %v2310_v8 }
 0x6fb   :  { %v1004_v51 = vmul.f32 1.442695, %v1001_v50 }
 0x6fc   :  { %v1017_v52 = vpop.permute.xlu1 %1016 }
 0x6fd   :  { %2237 = vpow2.f32 %v1004_v51  ;;  %2089 = vmatpush3.msra.mxu0 %v1017_v52 }
 0x6fe   :  { %2098 = vmatprep.subr.mxu0 %v2310_v8 }
 0x700   :  { %v1171_v61 = vpop.permute.xlu1 %1170 }
 0x703   :  { %v2236_v53 = vpop.eup %2235 }
 0x704   :  { %v1006_v54 = vsel %vm164_vm2, %v2236_v53, 0.0  ;;  %v1249_v1 = vpop.permute.xlu1 %1248 }
 0x705   :  { %1007 = vadd.xlane.f32.xlu0 %v1006_v54 }
 0x707   :  { %v2238_v55 = vpop.eup %2237 }
 0x708   :  { %v1009_v57 = vsel %vm164_vm2, %v2238_v55, 0.0  ;;  %v1247_v4 = vpop.permute.xlu1 %1246 }
 0x709   :  { %1010 = vadd.xlane.f32.xlu0 %v1009_v57 }
 0x71f   :  { %1168 = vrot.lane.b32.xlu0 %v2446_v12, %s2322_s17 }
 0x792   :  { %v1008_v59 = vpop.xlane.xlu0 %1007 }
 0x793   :  { %2239 = vrcp.f32 %v1008_v59 }
 0x796   :  { %v1011_v60 = vpop.xlane.xlu0 %1010 }
 0x797   :  { %2241 = vrcp.f32 %v1011_v60 }
 0x79a   :  { %v1169_v3 = vpop.permute.xlu0 %1168 }
 0x79d   :  { %v2240_v62 = vpop.eup %2239 }
 0x79e   :  { %v1014_v63 = vmul.f32 %v2240_v62, %v2236_v53 }
 0x7a0   :  { %2091 = vmatmul.mubr.msk.f32.vlgmr.msra.gmra.mrb[8].mxu0 %vm164_vm2, %v1014_v63 }
 0x7a1   :  { %v2242_v0 = vpop.eup %2241  ;;  %2099 = vmatpush3.xpose.msk.msra.mxu0 %vm164_vm2, %v1171_v61  ;;  %2100 = vmatprep.mubr.msk.f32.mxu0 %vm2311_vm1, %v2310_v8  ;;  %v1954_v61 = vld [vmem:[%s2705_s5] ss:$0 sm:$0xff] }
 0x7a2   :  { %v1015_v2 = vmul.f32 %v2242_v0, %v2238_v55  ;;  %2108 = vmatprep.subr.mxu0 %v2310_v8 }
 0x7a4   :  { %2096 = vmatmul.mubr.msk.f32.vlgmr.msra.gmra.mrb[14].mxu1 %vm164_vm2, %v1015_v2  ;;  %2101 = vmatmul.mubr.msk.f32.vlgmr.msra.gmra.mrb[10].mxu0 %vm164_vm2, %v1169_v3 }
 0x7a5   :  { %2104 = vmatpush3.xpose.msk.msra.mxu1 %vm164_vm2, %v1249_v1  ;;  %2105 = vmatprep.mubr.msk.f32.mxu1 %vm2311_vm1, %v2310_v8 }
 0x7a6   :  { %2113 = vmatprep.subr.mxu1 %v2310_v8  ;;  %2110 = vmatprep.mubr.msk.f32.mxu0 %vm2311_vm1, %v2310_v8 }
 0x7a8   :  { %2106 = vmatmul.mubr.msk.f32.vlgmr.msra.gmra.mrb[16].mxu1 %vm164_vm2, %v1247_v4 }
 0x7a9   :  { %2115 = vmatprep.mubr.msk.f32.mxu1 %vm2311_vm1, %v2310_v8 }
 0x873   :  { %v1088_v6 = vpop.f32.mrb[8].mxu0 }
 0x874   :  { %v2092_v9 = vpop.f32.mrb[9].mxu0 }
 0x877   :  { %v1164_v10 = vpop.f32.mrb[14].mxu1  ;;  %v1242_v11 = vpop.f32.mrb[10].mxu0 }
 0x878   :  { %v1324_v14 = vsel %vm326_vm5, -1e+09, %v1242_v11  ;;  %v2097_v15 = vpop.f32.mrb[15].mxu1  ;;  %v2102_v16 = vpop.f32.mrb[11].mxu0 }
 0x879   :  { %v1326_v17 = vsel %vm164_vm2, %v1324_v14, -inf }
 0x87a   :  { %1327 = vmax.xlane.f32.xlu0 %v1326_v17 }
 0x87b   :  { %v1320_v18 = vpop.f32.mrb[16].mxu1 }
 0x87c   :  { %v1325_v19 = vsel %vm327_vm6, -1e+09, %v1320_v18  ;;  %v2107_v20 = vpop.f32.mrb[17].mxu1  ;;  %v1672_v18 = vld [vmem:[%s2708_s8 + $0x8] sm:$0xff] }
 0x87d   :  { %v1329_v21 = vsel %vm164_vm2, %v1325_v19, -inf  ;;  %v1673_v20 = vld [vmem:[%s2708_s8 + $0x10] sm:$0xff] }
 0x87e   :  { %1330 = vmax.xlane.f32.xlu1 %v1329_v21  ;;  %v1674_v21 = vld [vmem:[%s2708_s8 + $0x18] sm:$0xff] }
 0x88f   :  { %1348 = vrot.lane.b32.xlu1 %v2446_v12, %s2323_s18 }
 0x893   :  { %1502 = vrot.lane.b32.xlu1 %v2544_v33, %s2309_s24 }
 0x897   :  { %1504 = vrot.lane.b32.xlu1 %v2546_v35, %s2309_s24 }
 0x89b   :  { %1512 = vrot.lane.b32.xlu1 %v1164_v10, %s2324_s19 }
 0x907   :  { %v1328_v8 = vpop.xlane.xlu0 %1327 }
 0x908   :  { %v1332_v23 = vsub.f32 %v1324_v14, %v1328_v8  ;;  %v2179_v8 = vpack.c.bf16 %v1674_v21, %v1673_v20  ;;  %v1965_v20 = vld [vmem:[%s2712_s12] ss:$0 sm:$0xff] }
 0x90a   :  { %v1334_v22 = vmul.f32 1.442695, %v1332_v23  ;;  %v1765_v23 = vld [vmem:[%s2710_s10] sm:$0xff] }
 0x90b   :  { %v1331_v25 = vpop.xlane.xlu1 %1330 }
 0x90c   :  { %2243 = vpow2.f32 %v1334_v22  ;;  %v1333_v24 = vsub.f32 %v1325_v19, %v1331_v25  ;;  %v1766_v22 = vld [vmem:[%s2710_s10 + $0x8] sm:$0xff]  ;;  %v1767_v25 = vld [vmem:[%s2710_s10 + $0x10] sm:$0xff] }
 0x90e   :  { %v1336_v26 = vmul.f32 1.442695, %v1333_v24  ;;  %v2183_v24 = vpack.c.bf16 %v1766_v22, %v1765_v23  ;;  %v1966_v22 = vld [vmem:[%s2713_s13] ss:$0 sm:$0xff] }
 0x90f   :  { %v1349_v27 = vpop.permute.xlu1 %1348 }
 0x910   :  { %2245 = vpow2.f32 %v1336_v26  ;;  %2109 = vmatpush3.msra.mxu0 %v1349_v27  ;;  %v1768_v26 = vld [vmem:[%s2710_s10 + $0x18] sm:$0xff] }
 0x911   :  { %v2187_v27 = vpack.c.bf16 %v1768_v26, %v1767_v25 }
 0x913   :  { %v1503_v47 = vpop.permute.xlu1 %1502 }
 0x914   :  { %v1524_v50 = vsel %vm164_vm2, %v2508_v56, %v1503_v47 }
 0x916   :  { %v2244_v28 = vpop.eup %2243 }
 0x917   :  { %v1338_v12 = vsel %vm164_vm2, %v2244_v28, 0.0  ;;  %v1505_v48 = vpop.permute.xlu1 %1504 }
 0x918   :  { %1339 = vadd.xlane.f32.xlu0 %v1338_v12  ;;  %v1525_v55 = vsel %vm164_vm2, %v2510_v58, %v1505_v48  ;;  %v1770_v12 = vld [vmem:[%s2710_s10 + $0x28] sm:$0xff]  ;;  %v1959_v48 = vld [vmem:[%s2709_s9] ss:$0 sm:$0xff] }
 0x91a   :  { %v2246_v29 = vpop.eup %2245 }
 0x91b   :  { %v1341_v30 = vsel %vm164_vm2, %v2246_v29, 0.0  ;;  %v1513_v51 = vpop.permute.xlu1 %1512 }
 0x91c   :  { %1342 = vadd.xlane.f32.xlu0 %v1341_v30  ;;  %v1528_v57 = vsel %vm1526_vm8, %v1525_v55, %v1513_v51  ;;  %v1962_v55 = vld [vmem:[%s2711_s11] ss:$0 sm:$0xff] }
 0x932   :  { %1424 = vrot.lane.b32.xlu0 %v2449_v13, %s2323_s18  ;;  %v1533_v13 = vld [vmem:[%s2704_s4 + $0x8] sm:$0xff] }
 0x933   :  { %v2167_v39 = vpack.c.bf16 %v1533_v13, %v1532_v38  ;;  %v1958_v13 = vld [vmem:[%s2707_s7] ss:$0 sm:$0xff] }
 0x935   :  { %2168 = vmatprep.subr.bf16.mxu0 %v2167_v39 }
 0x936   :  { %1510 = vrot.lane.b32.xlu0 %v1088_v6, %s2324_s19 }
 0x9a5   :  { %v1340_v31 = vpop.xlane.xlu0 %1339 }
 0x9a6   :  { %2247 = vrcp.f32 %v1340_v31 }
 0x9a9   :  { %v1343_v32 = vpop.xlane.xlu0 %1342 }
 0x9aa   :  { %2249 = vrcp.f32 %v1343_v32 }
 0x9ad   :  { %v1425_v33 = vpop.permute.xlu0 %1424 }
 0x9ae   :  { %2114 = vmatpush3.msra.mxu1 %v1425_v33 }
 0x9b0   :  { %v2248_v34 = vpop.eup %2247 }
 0x9b1   :  { %v1346_v35 = vmul.f32 %v2248_v34, %v2244_v28  ;;  %v1511_v49 = vpop.permute.xlu0 %1510  ;;  %v1769_v28 = vld [vmem:[%s2710_s10 + $0x20] sm:$0xff] }
 0x9b2   :  { %v1527_v52 = vsel %vm1526_vm8, %v1524_v50, %v1511_v49 }
 0x9b3   :  { %2111 = vmatmul.mubr.msk.f32.vlgmr.msra.gmra.mrb[12].mxu0 %vm164_vm2, %v1346_v35 }
 0x9b4   :  { %v2250_v36 = vpop.eup %2249  ;;  %2170 = vmatpush3.bf16.msra.mxu0 %v2167_v39 }
 0x9b5   :  { %v1347_v37 = vmul.f32 %v2250_v36, %v2246_v29  ;;  %2172 = vmatprep.subr.bf16.mxu0 %v2171_v42  ;;  %v2191_v29 = vpack.c.bf16 %v1770_v12, %v1769_v28 }
 0x9b7   :  { %2116 = vmatmul.mubr.msk.f32.vlgmr.msra.gmra.mrb[18].mxu1 %vm164_vm2, %v1347_v37  ;;  %v1957_v37 = vld [vmem:[%s2706_s6] ss:$0 sm:$0xff] }
 0x9b8   :  { %2174 = vmatpush3.bf16.msra.mxu0 %v2171_v42 }
 0x9b9   :  { %2184 = vmatprep.subr.bf16.mxu0 %v2183_v24 }
 0xa86   :  { %v1420_v43 = vpop.f32.mrb[12].mxu0 }
 0xa87   :  { %1518 = vrot.lane.b32.xlu0 %v1420_v43, %s2325_s25  ;;  %v2112_v44 = vpop.f32.mrb[13].mxu0 }
 0xa8a   :  { %v1496_v45 = vpop.f32.mrb[18].mxu1 }
 0xa8b   :  { %1520 = vrot.lane.b32.xlu1 %v1496_v45, %s2325_s25  ;;  %v2117_v46 = vpop.f32.mrb[19].mxu1  ;;  %v1771_v45 = vld [vmem:[%s2710_s10 + $0x30] sm:$0xff] }
 0xa8c   :  { %v1772_v46 = vld [vmem:[%s2710_s10 + $0x38] sm:$0xff] }
 0xa8d   :  { %v2195_v47 = vpack.c.bf16 %v1772_v46, %v1771_v45 }
 0xaf9   :  { %v1519_v53 = vpop.permute.xlu0 %1518 }
 0xafa   :  { %v1530_v54 = vsel %vm1529_vm7, %v1527_v52, %v1519_v53 }
 0xafb   :  { %2126 = vmatprep.mubr.msk.f32.mxu0 %vm79_vm0, %v1530_v54 }
 0xafd   :  { %v1521_v59 = vpop.permute.xlu1 %1520 }
 0xafe   :  { %v1531_v60 = vsel %vm1529_vm7, %v1528_v57, %v1521_v59 }
 0xaff   :  { %2127 = vmatmul.mubr.msk.f32.vlgmr.msra.gmra.mrb[14].mxu0 %vm79_vm0, %v1531_v60 }
 0xb00   :  { %2186 = vmatpush3.bf16.msra.mxu0 %v2183_v24 }
 0xb01   :  { %2188 = vmatprep.subr.bf16.mxu0 %v2187_v27 }
 0xb04   :  { %2190 = vmatpush3.bf16.msra.mxu0 %v2187_v27 }
 0xb05   :  { %2192 = vmatprep.subr.bf16.mxu0 %v2191_v29 }
 0xb08   :  { %2194 = vmatpush3.bf16.msra.mxu0 %v2191_v29 }
 0xb09   :  { %2196 = vmatprep.subr.bf16.mxu0 %v2195_v47 }
 0xb0c   :  { %2198 = vmatpush3.bf16.msra.mxu0 %v2195_v47 }
 0xbd2   :  { %v2128_v56 = vpop.f32.mrb[14].mxu0 }
 0xbd3   :  { %v1621_v62 = vadd.f32 %v2128_v56, %v1954_v61  ;;  %v1615_v63 = vpop.f32.mrb[15].mxu0 }
 0xbd4   :  { %v1616_v0 = vadd.f32 %v1954_v61, %v1615_v63 }
 0xbd5   :  { %v1625_v1 = vadd.f32 %v1621_v62, %v2433_v7 }
 0xbd6   :  { %v1624_v2 = vadd.f32 %v1616_v0, %v2429_v5  ;;  %v1671_v5 = vld [vmem:[%s2708_s8] sm:$0xff] }
 0xbd7   :  { %v1629_v3 = vsel %vm79_vm0, %v1625_v1, 0.0  ;;  %v2175_v19 = vpack.c.bf16 %v1672_v18, %v1671_v5 }
 0xbd8   :  { %1630 = vadd.xlane.f32.xlu1 %v1629_v3  ;;  %v1626_v58 = vsel %vm79_vm0, %v1624_v2, 0.0 }
 0xbd9   :  { %1627 = vadd.xlane.f32.xlu0 %v1626_v58  ;;  %2176 = vmatprep.subr.bf16.mxu1 %v2175_v19 }
 0xbda   :  { %2178 = vmatpush3.bf16.msra.mxu1 %v2175_v19 }
 0xbdb   :  { %2180 = vmatprep.subr.bf16.mxu1 %v2179_v8 }
 0xbde   :  { %2182 = vmatpush3.bf16.msra.mxu1 %v2179_v8 }
 0xc65   :  { %v1631_v4 = vpop.xlane.xlu1 %1630 }
 0xc66   :  { %v1634_v6 = vmul.f32 0.03125, %v1631_v4  ;;  %v1628_v9 = vpop.xlane.xlu0 %1627 }
 0xc67   :  { %v1633_v10 = vmul.f32 0.03125, %v1628_v9 }
 0xc68   :  { %v1636_v11 = vsub.f32 %v1625_v1, %v1634_v6 }
 0xc69   :  { %v1635_v14 = vsub.f32 %v1624_v2, %v1633_v10 }
 0xc6a   :  { %v1638_v17 = vmul.f32 %v1636_v11, %v1636_v11 }
 0xc6b   :  { %v1637_v15 = vmul.f32 %v1635_v14, %v1635_v14 }
 0xc6c   :  { %v1642_v7 = vsel %vm79_vm0, %v1638_v17, 0.0 }
 0xc6d   :  { %v1639_v16 = vsel %vm79_vm0, %v1637_v15, 0.0 }
 0xc6e   :  { %1640 = vadd.xlane.f32.xlu0 %v1639_v16 }
 0xc72   :  { %1643 = vadd.xlane.f32.xlu0 %v1642_v7 }
 0xcfb   :  { %v1641_v30 = vpop.xlane.xlu0 %1640 }
 0xcfc   :  { %v1645_v31 = vmul.f32 0.03125, %v1641_v30 }
 0xcfe   :  { %v1647_v32 = vadd.f32 1e-05, %v1645_v31 }
 0xcff   :  { %v1644_v33 = vpop.xlane.xlu0 %1643 }
 0xd00   :  { %2251 = vrsqrt.f32 %v1647_v32  ;;  %v1646_v34 = vmul.f32 0.03125, %v1644_v33 }
 0xd02   :  { %v1648_v35 = vadd.f32 1e-05, %v1646_v34 }
 0xd04   :  { %2253 = vrsqrt.f32 %v1648_v35 }
 0xd0a   :  { %v2252_v36 = vpop.eup %2251 }
 0xd0b   :  { %v1651_v38 = vmul.f32 %v2252_v36, %v1635_v14 }
 0xd0d   :  { %v1660_v39 = vmul.f32 %v1957_v37, %v1651_v38 }
 0xd0e   :  { %v2254_v40 = vpop.eup %2253 }
 0xd0f   :  { %v1652_v41 = vmul.f32 %v2254_v40, %v1636_v11  ;;  %v1669_v42 = vadd.f32 %v1958_v13, %v1660_v39 }
 0xd11   :  { %v1661_v43 = vmul.f32 %v1957_v37, %v1652_v41  ;;  %2137 = vmatprep.mubr.msk.f32.mxu1 %vm79_vm0, %v1669_v42 }
 0xd13   :  { %v1670_v44 = vadd.f32 %v1958_v13, %v1661_v43 }
 0xd15   :  { %2138 = vmatmul.mubr.msk.f32.vlgmr.msra.gmra.mrb[20].mxu1 %vm79_vm0, %v1670_v44 }
 0xde8   :  { %v2139_v49 = vpop.f32.mrb[20].mxu1 }
 0xde9   :  { %v1760_v50 = vadd.f32 %v2139_v49, %v1959_v48  ;;  %v1754_v51 = vpop.f32.mrb[21].mxu1 }
 0xdea   :  { %v1755_v52 = vadd.f32 %v1959_v48, %v1754_v51 }
 0xdeb   :  { %v1764_v54 = vmax.f32 %v1760_v50, 0.0 }
 0xdec   :  { %v1763_v53 = vmax.f32 %v1755_v52, 0.0 }
 0xdee   :  { %2156 = vmatprep.mubr.msk.f32.mxu0 %vm1780_vm9, %v1763_v53 }
 0xdef   :  { %2157 = vmatmul.mubr.msk.f32.vlgmr.msra.gmra.mrb[16].mxu0 %vm1780_vm9, %v1764_v54 }
 0xec2   :  { %v2158_v57 = vpop.f32.mrb[16].mxu0 }
 0xec3   :  { %v1859_v59 = vadd.f32 %v2158_v57, %v1962_v55  ;;  %v1853_v60 = vpop.f32.mrb[17].mxu0 }
 0xec4   :  { %v1854_v61 = vadd.f32 %v1962_v55, %v1853_v60 }
 0xec5   :  { %v1863_v56 = vadd.f32 %v1859_v59, %v1670_v44 }
 0xec6   :  { %v1862_v62 = vadd.f32 %v1854_v61, %v1669_v42 }
 0xec7   :  { %v1867_v63 = vsel %vm79_vm0, %v1863_v56, 0.0 }
 0xec8   :  { %1868 = vadd.xlane.f32.xlu0 %v1867_v63  ;;  %v1864_v0 = vsel %vm79_vm0, %v1862_v62, 0.0 }
 0xec9   :  { %1865 = vadd.xlane.f32.xlu1 %v1864_v0 }
 0xf55   :  { %v1869_v1 = vpop.xlane.xlu0 %1868 }
 0xf56   :  { %v1871_v2 = vmul.f32 0.03125, %v1869_v1  ;;  %v1866_v3 = vpop.xlane.xlu1 %1865 }
 0xf57   :  { %v1870_v58 = vmul.f32 0.03125, %v1866_v3 }
 0xf58   :  { %v1873_v4 = vsub.f32 %v1863_v56, %v1871_v2 }
 0xf59   :  { %v1872_v6 = vsub.f32 %v1862_v62, %v1870_v58 }
 0xf5a   :  { %v1875_v9 = vmul.f32 %v1873_v4, %v1873_v4 }
 0xf5b   :  { %v1874_v10 = vmul.f32 %v1872_v6, %v1872_v6 }
 0xf5c   :  { %v1879_v11 = vsel %vm79_vm0, %v1875_v9, 0.0 }
 0xf5d   :  { %1880 = vadd.xlane.f32.xlu0 %v1879_v11  ;;  %v1876_v14 = vsel %vm79_vm0, %v1874_v10, 0.0 }
 0xf5e   :  { %1877 = vadd.xlane.f32.xlu1 %v1876_v14 }
 0xfea   :  { %v1881_v15 = vpop.xlane.xlu0 %1880 }
 0xfeb   :  { %v1883_v16 = vmul.f32 0.03125, %v1881_v15  ;;  %v1878_v17 = vpop.xlane.xlu1 %1877 }
 0xfec   :  { %v1882_v7 = vmul.f32 0.03125, %v1878_v17 }
 0xfed   :  { %v1885_v5 = vadd.f32 1e-05, %v1883_v16 }
 0xfee   :  { %v1884_v18 = vadd.f32 1e-05, %v1882_v7 }
 0xfef   :  { %2255 = vrsqrt.f32 %v1885_v5 }
 0xff0   :  { %2257 = vrsqrt.f32 %v1884_v18 }
 0xff9   :  { %v2256_v19 = vpop.eup %2255 }
 0xffa   :  { %v2258_v21 = vpop.eup %2257  ;;  %v1889_v8 = vmul.f32 %v2256_v19, %v1873_v4 }
 0xffb   :  { %v1888_v23 = vmul.f32 %v2258_v21, %v1872_v6 }
 0xffc   :  { %v1898_v25 = vmul.f32 %v1965_v20, %v1889_v8 }
 0xffd   :  { %v1897_v24 = vmul.f32 %v1965_v20, %v1888_v23 }
 0xffe   :  { %v1907_v26 = vadd.f32 %v1966_v22, %v1898_v25 }
 0xfff   :  { %v1906_v27 = vadd.f32 %v1966_v22, %v1897_v24 }
0x1000   :  { %1909 = vst.msk [vmem:[#allocation5 + $0x8] sm:$0xff] %vm79_vm0, %v1907_v26 }
0x1001   :  { %1908 = vst.msk [vmem:[#allocation5] sm:$0xff] %vm79_vm0, %v1906_v27 }
0x1002   :  { %2292 = shalt.err (!%p2289_p12)
}
0x1003   :  { %s2293_s20 = scalar_lea.hbm %s2714_s14, 256 }
0x1004   :  { %p2294_p13 = scmp.ne.s32.totalorder %s2714_s14, %s2293_s20  ;;  %p2297_p0 = scmp.lt.u32.totalorder %s2293_s20, %s2714_s14 }
0x1006   :  { %p2299_p1 = pnand %p2297_p0, %p2294_p13 }
0x1008   :  { %2302 = shalt.err (!%p2299_p1)
}
0x1009   :  { %1921 = dma.vmem_to_hbm [thread:$0]  %s1916_s30, 256, %s2714_s14, [#allocation4], %s2308_s23, %s2308_s23, %s2309_s24  }
0x100a   :  { %2305 = dma.done.wait [#allocation4], 256  }
0x100b   :  { %2306 = vsyncadd [#allocation4], 4294967040 }
0x100c   :  { %1925 = vsyncpa [#allocation3], 1 }
0x100d   :  { %1926 = vsyncpa [#allocation4], 1 }

</bundles_post_ra>
